<compile_context>
chip_gen: v6e
topology: v6e:2x2x1
jax: 0.10.0
libtpu: 0.0.40
codegen_flags: <defaults>
</compile_context>

<pallas_src>
import functools

import jax
import jax.numpy as jnp
import numpy as np
from jax.experimental import pallas as pl
from jax.experimental.pallas import tpu as pltpu


def _attention_kernel(bias_ref, v_ref, k_ref, q_ref,
                      wvb_ref, wkb_ref, wqb_ref, wor_ref, bo_ref,
                      out_ref, *, heads):
    """One batch element per grid step. Projections, attention, fc_out all on-chip."""
    vh = v_ref[0]                                   # (H, Sv, hd)  native dtype
    kh = k_ref[0]                                   # (H, Sk, hd)
    qh = q_ref[0]                                   # (H, Sq, hd)

    # Shared per-head projections as ONE batched matmul per tensor.  The weights are
    # pre-transposed and broadcast over H in the wrapper; 1/sqrt(E) is folded into the
    # query weight.  No in-kernel transposes / lane slicing.
    vp = jnp.einsum('hkd,hde->hke', vh, wvb_ref[...],
                    preferred_element_type=jnp.float32)              # (H, Sv, hd) f32
    kp = jnp.einsum('hkd,hde->hke', kh, wkb_ref[...],
                    preferred_element_type=jnp.float32)              # (H, Sk, hd) f32
    qp = jnp.einsum('hqd,hde->hqe', qh, wqb_ref[...],
                    preferred_element_type=jnp.float32)              # (H, Sq, hd) f32

    # energy[h,q,k] at bf16 MXU rate with f32 accumulation (scale already folded in).
    energy = jnp.einsum('hqd,hkd->hqk',
                        qp.astype(jnp.bfloat16), kp.astype(jnp.bfloat16),
                        preferred_element_type=jnp.float32)          # (H, Sq, Sk) f32
    # bf16 additive mask bias (0 / -1e20); the add promotes per-vreg -- no f32 copy of
    # the (H, Sq, Sk) bias block is materialized.
    energy = energy + bias_ref[0]

    # Softmax over keys in f32; EUP approximate reciprocal for the denominator.
    m = jnp.max(energy, axis=-1, keepdims=True)
    p = jnp.exp(energy - m)
    denom = jnp.sum(p, axis=-1, keepdims=True)
    attn = p * pl.reciprocal(denom, approx=True)

    # context[h,q,d] = sum_k attn[h,q,k] * vp[h,k,d] at bf16 MXU rate, f32 accumulation.
    ctx = jnp.einsum('hqk,hkd->hqd',
                     attn.astype(jnp.bfloat16), vp.astype(jnp.bfloat16),
                     preferred_element_type=jnp.float32)             # (H, Sq, hd) f32

    # fc_out without any head-concat scratch: accumulate per head into a full-width
    # (Sq, E) f32 block.  ctx[h] / wor_ref[h] are leading-dim picks (no masked lane
    # extracts, no vst.msk partial stores), and the output store below is lane-dense.
    sq = ctx.shape[1]
    emb = wor_ref.shape[2]
    acc = jnp.zeros((sq, emb), jnp.float32)
    for h in range(heads):
        acc = acc + jnp.dot(ctx[h], wor_ref[h], preferred_element_type=jnp.float32)
    out = acc + bo_ref[...].astype(jnp.float32)                      # (Sq, E)
    out_ref[0] = out.astype(out_ref.dtype)


def self_attention_h(values, keys, query, mask, params, *, embed_size, heads):
    """values/keys/query: (N, S, E); mask: (N, H, Sq, Sk) int; returns (N, Sq, E)."""
    head_dim = embed_size // heads
    N, q_len, _ = query.shape
    k_len = keys.shape[1]
    v_len = values.shape[1]

    wv, wk, wq, wo, bo = params
    scale = 1.0 / (embed_size ** 0.5)

    # Wrapper-side layout plumbing: split heads OUTSIDE the kernel -> (N, H, S, hd).
    def to_heads(x, s_len):
        return x.reshape(N, s_len, heads, head_dim).transpose(0, 2, 1, 3)

    vh = to_heads(values, v_len)
    kh = to_heads(keys, k_len)
    qh = to_heads(query, q_len)

    # Shared per-head weights, pre-transposed (y = x @ W.T) and broadcast over heads so
    # the in-kernel projection is a single batched matmul per tensor.  The softmax scale
    # is folded into the query weight.
    wv_b = jnp.tile(wv.T[None, :, :], (heads, 1, 1))                        # (H, hd, hd)
    wk_b = jnp.tile(wk.T[None, :, :], (heads, 1, 1))                        # (H, hd, hd)
    wq_b = jnp.tile((wq.T * jnp.asarray(scale, wq.dtype))[None, :, :],
                    (heads, 1, 1))                                          # (H, hd, hd)
    wo_r = wo.T.reshape(heads, head_dim, embed_size)                        # (H, hd, E)
    bo2d = bo.reshape(1, embed_size)

    # Additive mask bias in bf16: -1e20 where masked, 0 elsewhere (halves mask HBM
    # traffic vs int32 and replaces compare+select with a single add in the kernel).
    bias = jnp.where(mask == 0, jnp.float32(-1e20), jnp.float32(0.0)).astype(jnp.bfloat16)

    kernel = functools.partial(_attention_kernel, heads=heads)

    batched4 = lambda s_len, last: pl.BlockSpec((1, heads, s_len, last),
                                                lambda n: (n, 0, 0, 0))
    full = lambda a: pl.BlockSpec(a.shape, lambda n: (0,) * a.ndim)

    return pl.pallas_call(
        kernel,
        out_shape=jax.ShapeDtypeStruct((N, q_len, embed_size), query.dtype),
        grid_spec=pltpu.PrefetchScalarGridSpec(
            num_scalar_prefetch=0,
            grid=(N,),
            in_specs=[
                batched4(q_len, k_len),        # bias  (1, H, Sq, Sk)
                batched4(v_len, head_dim),     # values (1, H, Sv, hd)
                batched4(k_len, head_dim),     # keys   (1, H, Sk, hd)
                batched4(q_len, head_dim),     # query  (1, H, Sq, hd)
                full(wv_b), full(wk_b), full(wq_b),
                full(wo_r), full(bo2d),
            ],
            out_specs=pl.BlockSpec((1, q_len, embed_size), lambda n: (n, 0, 0)),
        ),
        compiler_params=pltpu.CompilerParams(dimension_semantics=("parallel",)),
    )(bias, vh, kh, qh, wv_b, wk_b, wq_b, wo_r, bo2d)


def _reference(values, keys, query, mask, params, *, embed_size, heads):
    """Pure-JAX mirror of the PyTorch forward, for verification."""
    head_dim = embed_size // heads
    wv, wk, wq, wo, bo = params
    N, q_len, _ = query.shape
    v_len = values.shape[1]
    k_len = keys.shape[1]

    v = values.reshape(N, v_len, heads, head_dim) @ wv.T
    k = keys.reshape(N, k_len, heads, head_dim) @ wk.T
    q = query.reshape(N, q_len, heads, head_dim) @ wq.T
    energy = jnp.einsum('nqhd,nkhd->nhqk', q, k)
    energy = jnp.where(mask == 0, -1e20, energy)
    attn = jax.nn.softmax(energy / (embed_size ** 0.5), axis=3)
    out = jnp.einsum('nhql,nlhd->nqhd', attn, v).reshape(N, q_len, heads * head_dim)
    return out @ wo.T + bo


if __name__ == "__main__":
    N, S, embed_size, heads = 2, 8, 32, 4
    head_dim = embed_size // heads

    key = jax.random.PRNGKey(0)
    kx, kv, kk, kq, kwv, kwk, kwq, kwo, kbo, kmask = jax.random.split(key, 10)

    values = jax.random.normal(kv, (N, S, embed_size), dtype=jnp.float32)
    keys_in = jax.random.normal(kk, (N, S, embed_size), dtype=jnp.float32)
    query = jax.random.normal(kq, (N, S, embed_size), dtype=jnp.float32)

    # mask: (N, heads, q_len, k_len); mix of zeros and ones, deterministic
    mask = (jax.random.uniform(kmask, (N, heads, S, S)) > 0.2).astype(jnp.int32)
    # ensure at least one unmasked key per query row (avoid degenerate all-masked rows)
    mask = mask.at[..., 0].set(1)

    def init_linear(k, out_f, in_f):
        bound = 1.0 / np.sqrt(in_f)
        return jax.random.uniform(k, (out_f, in_f), minval=-bound, maxval=bound,
                                  dtype=jnp.float32)

    wv = init_linear(kwv, head_dim, head_dim)
    wk = init_linear(kwk, head_dim, head_dim)
    wq = init_linear(kwq, head_dim, head_dim)
    wo = init_linear(kwo, embed_size, heads * head_dim)
    bo = jax.random.uniform(kbo, (embed_size,),
                            minval=-1.0 / np.sqrt(heads * head_dim),
                            maxval=1.0 / np.sqrt(heads * head_dim),
                            dtype=jnp.float32)
    params = (wv, wk, wq, wo, bo)

    out = self_attention_h(values, keys_in, query, mask, params,
                           embed_size=embed_size, heads=heads)
    out = jax.block_until_ready(out)

    ref = _reference(values, keys_in, query, mask, params,
                     embed_size=embed_size, heads=heads)
    # Tolerance accounts for the bf16-fed QK^T / attn@V MXU matmuls (f32 accumulation)
    # and the EUP approximate reciprocal in the softmax; a wrong kernel would be off
    # by O(0.1-1), far outside this band.
    np.testing.assert_allclose(np.asarray(out), np.asarray(ref), rtol=1e-2, atol=1e-2)

    print("KERNEL_OK")
</pallas_src>

<mosaic_0001>
module attributes {stable_mosaic.version = 11 : i64} {
  func.func @_attention_kernel(%arg0: i32, %arg1: memref<1x4x8x8xbf16, #tpu.memory_space<vmem>>, %arg2: memref<1x4x8x8xf32, #tpu.memory_space<vmem>>, %arg3: memref<1x4x8x8xf32, #tpu.memory_space<vmem>>, %arg4: memref<1x4x8x8xf32, #tpu.memory_space<vmem>>, %arg5: memref<4x8x8xf32, #tpu.memory_space<vmem>>, %arg6: memref<4x8x8xf32, #tpu.memory_space<vmem>>, %arg7: memref<4x8x8xf32, #tpu.memory_space<vmem>>, %arg8: memref<4x8x32xf32, #tpu.memory_space<vmem>>, %arg9: memref<1x32xf32, #tpu.memory_space<vmem>>, %arg10: memref<1x8x32xf32, #tpu.memory_space<vmem>>) attributes {dimension_semantics = [#tpu.dimension_semantics<parallel>], iteration_bounds = array<i64: 2>, scalar_prefetch = 0 : i64, scratch_operands = 0 : i64, tpu.core_type = #tpu.core_type<tc>, window_params = [{transform_indices = @transform_0, window_bounds = array<i64: 1, 4, 8, 8>}, {transform_indices = @transform_1, window_bounds = array<i64: 1, 4, 8, 8>}, {transform_indices = @transform_2, window_bounds = array<i64: 1, 4, 8, 8>}, {transform_indices = @transform_3, window_bounds = array<i64: 1, 4, 8, 8>}, {pipeline_mode = #tpu.pipeline_mode<synchronous>, transform_indices = @transform_4, window_bounds = array<i64: 4, 8, 8>}, {pipeline_mode = #tpu.pipeline_mode<synchronous>, transform_indices = @transform_5, window_bounds = array<i64: 4, 8, 8>}, {pipeline_mode = #tpu.pipeline_mode<synchronous>, transform_indices = @transform_6, window_bounds = array<i64: 4, 8, 8>}, {pipeline_mode = #tpu.pipeline_mode<synchronous>, transform_indices = @transform_7, window_bounds = array<i64: 4, 8, 32>}, {pipeline_mode = #tpu.pipeline_mode<synchronous>, transform_indices = @transform_8, window_bounds = array<i64: 1, 32>}, {transform_indices = @transform_9, window_bounds = array<i64: 1, 8, 32>}]} {
    %c0 = arith.constant 0 : index
    %c0_0 = arith.constant 0 : index
    %c0_1 = arith.constant 0 : index
    %c0_2 = arith.constant 0 : index
    %0 = vector.load %arg2[%c0, %c0_0, %c0_1, %c0_2] : memref<1x4x8x8xf32, #tpu.memory_space<vmem>>, vector<1x4x8x8xf32>
    %1 = vector.shape_cast %0 : vector<1x4x8x8xf32> to vector<4x8x8xf32>
    %c0_3 = arith.constant 0 : index
    %c0_4 = arith.constant 0 : index
    %c0_5 = arith.constant 0 : index
    %c0_6 = arith.constant 0 : index
    %2 = vector.load %arg3[%c0_3, %c0_4, %c0_5, %c0_6] : memref<1x4x8x8xf32, #tpu.memory_space<vmem>>, vector<1x4x8x8xf32>
    %3 = vector.shape_cast %2 : vector<1x4x8x8xf32> to vector<4x8x8xf32>
    %c0_7 = arith.constant 0 : index
    %c0_8 = arith.constant 0 : index
    %c0_9 = arith.constant 0 : index
    %c0_10 = arith.constant 0 : index
    %4 = vector.load %arg4[%c0_7, %c0_8, %c0_9, %c0_10] : memref<1x4x8x8xf32, #tpu.memory_space<vmem>>, vector<1x4x8x8xf32>
    %5 = vector.shape_cast %4 : vector<1x4x8x8xf32> to vector<4x8x8xf32>
    %c0_11 = arith.constant 0 : index
    %c0_12 = arith.constant 0 : index
    %c0_13 = arith.constant 0 : index
    %6 = vector.load %arg5[%c0_11, %c0_12, %c0_13] : memref<4x8x8xf32, #tpu.memory_space<vmem>>, vector<4x8x8xf32>
    "tpu.trace_start"() <{level = 10 : i32, message = "hkd,hde->hke"}> : () -> ()
    %cst = arith.constant dense<0.000000e+00> : vector<4x8x8xf32>
    %7 = tpu.matmul %1, %6, %cst {dimension_numbers = #tpu.dot_dimension_numbers<[2], [1], [1], [2], [0, 0, 0, 1, 1, 2], [0], [0]>} : vector<4x8x8xf32>, vector<4x8x8xf32>, vector<4x8x8xf32> -> vector<4x8x8xf32>
    "tpu.trace_stop"() : () -> ()
    %c0_14 = arith.constant 0 : index
    %c0_15 = arith.constant 0 : index
    %c0_16 = arith.constant 0 : index
    %8 = vector.load %arg6[%c0_14, %c0_15, %c0_16] : memref<4x8x8xf32, #tpu.memory_space<vmem>>, vector<4x8x8xf32>
    "tpu.trace_start"() <{level = 10 : i32, message = "hkd,hde->hke"}> : () -> ()
    %cst_17 = arith.constant dense<0.000000e+00> : vector<4x8x8xf32>
    %9 = tpu.matmul %3, %8, %cst_17 {dimension_numbers = #tpu.dot_dimension_numbers<[2], [1], [1], [2], [0, 0, 0, 1, 1, 2], [0], [0]>} : vector<4x8x8xf32>, vector<4x8x8xf32>, vector<4x8x8xf32> -> vector<4x8x8xf32>
    "tpu.trace_stop"() : () -> ()
    %c0_18 = arith.constant 0 : index
    %c0_19 = arith.constant 0 : index
    %c0_20 = arith.constant 0 : index
    %10 = vector.load %arg7[%c0_18, %c0_19, %c0_20] : memref<4x8x8xf32, #tpu.memory_space<vmem>>, vector<4x8x8xf32>
    "tpu.trace_start"() <{level = 10 : i32, message = "hqd,hde->hqe"}> : () -> ()
    %cst_21 = arith.constant dense<0.000000e+00> : vector<4x8x8xf32>
    %11 = tpu.matmul %5, %10, %cst_21 {dimension_numbers = #tpu.dot_dimension_numbers<[2], [1], [1], [2], [0, 0, 0, 1, 1, 2], [0], [0]>} : vector<4x8x8xf32>, vector<4x8x8xf32>, vector<4x8x8xf32> -> vector<4x8x8xf32>
    "tpu.trace_stop"() : () -> ()
    %12 = arith.truncf %11 : vector<4x8x8xf32> to vector<4x8x8xbf16>
    %13 = arith.truncf %9 : vector<4x8x8xf32> to vector<4x8x8xbf16>
    "tpu.trace_start"() <{level = 10 : i32, message = "hqd,hkd->hqk"}> : () -> ()
    %cst_22 = arith.constant dense<0.000000e+00> : vector<4x8x8xf32>
    %14 = tpu.matmul %12, %13, %cst_22 {dimension_numbers = #tpu.dot_dimension_numbers<[2], [2], [1], [1], [0, 0, 0, 1, 1, 1], [0], [0]>} : vector<4x8x8xbf16>, vector<4x8x8xbf16>, vector<4x8x8xf32> -> vector<4x8x8xf32>
    "tpu.trace_stop"() : () -> ()
    %c0_23 = arith.constant 0 : index
    %c0_24 = arith.constant 0 : index
    %c0_25 = arith.constant 0 : index
    %c0_26 = arith.constant 0 : index
    %15 = vector.load %arg1[%c0_23, %c0_24, %c0_25, %c0_26] : memref<1x4x8x8xbf16, #tpu.memory_space<vmem>>, vector<1x4x8x8xbf16>
    %16 = vector.shape_cast %15 : vector<1x4x8x8xbf16> to vector<4x8x8xbf16>
    %17 = arith.extf %16 : vector<4x8x8xbf16> to vector<4x8x8xf32>
    %18 = arith.addf %14, %17 : vector<4x8x8xf32>
    %cst_27 = arith.constant dense<0xFF800000> : vector<4x8xf32>
    %19 = vector.multi_reduction <maximumf>, %18, %cst_27 [2] : vector<4x8x8xf32> to vector<4x8xf32>
    %20 = vector.shape_cast %19 : vector<4x8xf32> to vector<4x8x1xf32>
    %21 = vector.broadcast %20 : vector<4x8x1xf32> to vector<4x8x8xf32>
    %22 = arith.subf %18, %21 : vector<4x8x8xf32>
    %23 = math.exp %22 : vector<4x8x8xf32>
    %cst_28 = arith.constant dense<0.000000e+00> : vector<4x8xf32>
    %24 = vector.multi_reduction <add>, %23, %cst_28 [2] : vector<4x8x8xf32> to vector<4x8xf32>
    %25 = vector.shape_cast %24 : vector<4x8xf32> to vector<4x8x1xf32>
    %26 = tpu.reciprocal %25 {approx = true} : vector<4x8x1xf32> -> vector<4x8x1xf32>
    %27 = vector.broadcast %26 : vector<4x8x1xf32> to vector<4x8x8xf32>
    %28 = arith.mulf %23, %27 : vector<4x8x8xf32>
    %29 = arith.truncf %28 : vector<4x8x8xf32> to vector<4x8x8xbf16>
    %30 = arith.truncf %7 : vector<4x8x8xf32> to vector<4x8x8xbf16>
    "tpu.trace_start"() <{level = 10 : i32, message = "hqk,hkd->hqd"}> : () -> ()
    %cst_29 = arith.constant dense<0.000000e+00> : vector<4x8x8xf32>
    %31 = tpu.matmul %29, %30, %cst_29 {dimension_numbers = #tpu.dot_dimension_numbers<[2], [1], [1], [2], [0, 0, 0, 1, 1, 2], [0], [0]>} : vector<4x8x8xbf16>, vector<4x8x8xbf16>, vector<4x8x8xf32> -> vector<4x8x8xf32>
    %cst_30 = arith.constant 0.000000e+00 : f32
    "tpu.trace_stop"() : () -> ()
    %32 = vector.broadcast %cst_30 : f32 to vector<8x32xf32>
    %33 = vector.extract_strided_slice %31 {offsets = [0, 0, 0], sizes = [1, 8, 8], strides = [1, 1, 1]} : vector<4x8x8xf32> to vector<1x8x8xf32>
    %34 = vector.shape_cast %33 : vector<1x8x8xf32> to vector<8x8xf32>
    %c0_31 = arith.constant 0 : index
    %c0_32 = arith.constant 0 : index
    %c0_33 = arith.constant 0 : index
    %35 = vector.load %arg8[%c0_31, %c0_32, %c0_33] : memref<4x8x32xf32, #tpu.memory_space<vmem>>, vector<1x8x32xf32>
    %36 = vector.shape_cast %35 : vector<1x8x32xf32> to vector<8x32xf32>
    %cst_34 = arith.constant dense<0.000000e+00> : vector<8x32xf32>
    %37 = tpu.matmul %34, %36, %cst_34 {dimension_numbers = #tpu.dot_dimension_numbers<[1], [0], [0], [1], [0, 0, 1, 1], [], []>} : vector<8x8xf32>, vector<8x32xf32>, vector<8x32xf32> -> vector<8x32xf32>
    %38 = arith.addf %32, %37 : vector<8x32xf32>
    %39 = vector.extract_strided_slice %31 {offsets = [1, 0, 0], sizes = [1, 8, 8], strides = [1, 1, 1]} : vector<4x8x8xf32> to vector<1x8x8xf32>
    %40 = vector.shape_cast %39 : vector<1x8x8xf32> to vector<8x8xf32>
    %c1 = arith.constant 1 : index
    %c0_35 = arith.constant 0 : index
    %c0_36 = arith.constant 0 : index
    %41 = vector.load %arg8[%c1, %c0_35, %c0_36] : memref<4x8x32xf32, #tpu.memory_space<vmem>>, vector<1x8x32xf32>
    %42 = vector.shape_cast %41 : vector<1x8x32xf32> to vector<8x32xf32>
    %cst_37 = arith.constant dense<0.000000e+00> : vector<8x32xf32>
    %43 = tpu.matmul %40, %42, %cst_37 {dimension_numbers = #tpu.dot_dimension_numbers<[1], [0], [0], [1], [0, 0, 1, 1], [], []>} : vector<8x8xf32>, vector<8x32xf32>, vector<8x32xf32> -> vector<8x32xf32>
    %44 = arith.addf %38, %43 : vector<8x32xf32>
    %45 = vector.extract_strided_slice %31 {offsets = [2, 0, 0], sizes = [1, 8, 8], strides = [1, 1, 1]} : vector<4x8x8xf32> to vector<1x8x8xf32>
    %46 = vector.shape_cast %45 : vector<1x8x8xf32> to vector<8x8xf32>
    %c2 = arith.constant 2 : index
    %c0_38 = arith.constant 0 : index
    %c0_39 = arith.constant 0 : index
    %47 = vector.load %arg8[%c2, %c0_38, %c0_39] : memref<4x8x32xf32, #tpu.memory_space<vmem>>, vector<1x8x32xf32>
    %48 = vector.shape_cast %47 : vector<1x8x32xf32> to vector<8x32xf32>
    %cst_40 = arith.constant dense<0.000000e+00> : vector<8x32xf32>
    %49 = tpu.matmul %46, %48, %cst_40 {dimension_numbers = #tpu.dot_dimension_numbers<[1], [0], [0], [1], [0, 0, 1, 1], [], []>} : vector<8x8xf32>, vector<8x32xf32>, vector<8x32xf32> -> vector<8x32xf32>
    %50 = arith.addf %44, %49 : vector<8x32xf32>
    %51 = vector.extract_strided_slice %31 {offsets = [3, 0, 0], sizes = [1, 8, 8], strides = [1, 1, 1]} : vector<4x8x8xf32> to vector<1x8x8xf32>
    %52 = vector.shape_cast %51 : vector<1x8x8xf32> to vector<8x8xf32>
    %c3 = arith.constant 3 : index
    %c0_41 = arith.constant 0 : index
    %c0_42 = arith.constant 0 : index
    %53 = vector.load %arg8[%c3, %c0_41, %c0_42] : memref<4x8x32xf32, #tpu.memory_space<vmem>>, vector<1x8x32xf32>
    %54 = vector.shape_cast %53 : vector<1x8x32xf32> to vector<8x32xf32>
    %cst_43 = arith.constant dense<0.000000e+00> : vector<8x32xf32>
    %55 = tpu.matmul %52, %54, %cst_43 {dimension_numbers = #tpu.dot_dimension_numbers<[1], [0], [0], [1], [0, 0, 1, 1], [], []>} : vector<8x8xf32>, vector<8x32xf32>, vector<8x32xf32> -> vector<8x32xf32>
    %56 = arith.addf %50, %55 : vector<8x32xf32>
    %c0_44 = arith.constant 0 : index
    %c0_45 = arith.constant 0 : index
    %57 = vector.load %arg9[%c0_44, %c0_45] : memref<1x32xf32, #tpu.memory_space<vmem>>, vector<1x32xf32>
    %58 = vector.broadcast %57 : vector<1x32xf32> to vector<8x32xf32>
    %59 = arith.addf %56, %58 : vector<8x32xf32>
    %c0_46 = arith.constant 0 : index
    %c0_47 = arith.constant 0 : index
    %c0_48 = arith.constant 0 : index
    %60 = vector.load %arg10[%c0_46, %c0_47, %c0_48] : memref<1x8x32xf32, #tpu.memory_space<vmem>>, vector<1x8x32xf32>
    %61 = vector.shape_cast %60 : vector<1x8x32xf32> to vector<8x32xf32>
    %62 = vector.shape_cast %59 : vector<8x32xf32> to vector<1x8x32xf32>
    tpu.vector_store %arg10[%c0_46, %c0_47, %c0_48], %62 {strides = array<i32>} : memref<1x8x32xf32, #tpu.memory_space<vmem>>, vector<1x8x32xf32>,
    return
  }
  func.func @transform_0(%arg0: i32) -> (i32, i32, i32, i32) {
    %c0_i32 = arith.constant 0 : i32
    %c0_i32_0 = arith.constant 0 : i32
    %c0_i32_1 = arith.constant 0 : i32
    %c0_i32_2 = arith.constant 0 : i32
    return %arg0, %c0_i32, %c0_i32_0, %c0_i32_1 : i32, i32, i32, i32
  }
  func.func @transform_1(%arg0: i32) -> (i32, i32, i32, i32) {
    %c0_i32 = arith.constant 0 : i32
    %c0_i32_0 = arith.constant 0 : i32
    %c0_i32_1 = arith.constant 0 : i32
    %c0_i32_2 = arith.constant 0 : i32
    return %arg0, %c0_i32, %c0_i32_0, %c0_i32_1 : i32, i32, i32, i32
  }
  func.func @transform_2(%arg0: i32) -> (i32, i32, i32, i32) {
    %c0_i32 = arith.constant 0 : i32
    %c0_i32_0 = arith.constant 0 : i32
    %c0_i32_1 = arith.constant 0 : i32
    %c0_i32_2 = arith.constant 0 : i32
    return %arg0, %c0_i32, %c0_i32_0, %c0_i32_1 : i32, i32, i32, i32
  }
  func.func @transform_3(%arg0: i32) -> (i32, i32, i32, i32) {
    %c0_i32 = arith.constant 0 : i32
    %c0_i32_0 = arith.constant 0 : i32
    %c0_i32_1 = arith.constant 0 : i32
    %c0_i32_2 = arith.constant 0 : i32
    return %arg0, %c0_i32, %c0_i32_0, %c0_i32_1 : i32, i32, i32, i32
  }
  func.func @transform_4(%arg0: i32) -> (i32, i32, i32) {
    %c0_i32 = arith.constant 0 : i32
    %c0_i32_0 = arith.constant 0 : i32
    %c0_i32_1 = arith.constant 0 : i32
    %c0_i32_2 = arith.constant 0 : i32
    return %c0_i32, %c0_i32_0, %c0_i32_1 : i32, i32, i32
  }
  func.func @transform_5(%arg0: i32) -> (i32, i32, i32) {
    %c0_i32 = arith.constant 0 : i32
    %c0_i32_0 = arith.constant 0 : i32
    %c0_i32_1 = arith.constant 0 : i32
    %c0_i32_2 = arith.constant 0 : i32
    return %c0_i32, %c0_i32_0, %c0_i32_1 : i32, i32, i32
  }
  func.func @transform_6(%arg0: i32) -> (i32, i32, i32) {
    %c0_i32 = arith.constant 0 : i32
    %c0_i32_0 = arith.constant 0 : i32
    %c0_i32_1 = arith.constant 0 : i32
    %c0_i32_2 = arith.constant 0 : i32
    return %c0_i32, %c0_i32_0, %c0_i32_1 : i32, i32, i32
  }
  func.func @transform_7(%arg0: i32) -> (i32, i32, i32) {
    %c0_i32 = arith.constant 0 : i32
    %c0_i32_0 = arith.constant 0 : i32
    %c0_i32_1 = arith.constant 0 : i32
    %c0_i32_2 = arith.constant 0 : i32
    return %c0_i32, %c0_i32_0, %c0_i32_1 : i32, i32, i32
  }
  func.func @transform_8(%arg0: i32) -> (i32, i32) {
    %c0_i32 = arith.constant 0 : i32
    %c0_i32_0 = arith.constant 0 : i32
    %c0_i32_1 = arith.constant 0 : i32
    return %c0_i32, %c0_i32_0 : i32, i32
  }
  func.func @transform_9(%arg0: i32) -> (i32, i32, i32) {
    %c0_i32 = arith.constant 0 : i32
    %c0_i32_0 = arith.constant 0 : i32
    %c0_i32_1 = arith.constant 0 : i32
    return %arg0, %c0_i32, %c0_i32_0 : i32, i32, i32
  }
}

</mosaic_0001>

<bundles_post_ra>
// kernel: tpu_custom_call.1
= control target key start
LH: loop header
LB: loop body
LE: loop exit
PB: predicated region body
PF: predicated region fallthrough
CT: control target
= control target key end

     0   :  { %s3588_s0 = inlined_call_operand.hbm [shape: bf16[2,4,8,8], index: 0, kind: input, shape index: {}]   ;;  %s3589_s1 = inlined_call_operand.hbm [shape: f32[2,4,8,8], index: 1, kind: input, shape index: {}]   ;;  %s3590_s2 = inlined_call_operand.hbm [shape: f32[2,4,8,8], index: 2, kind: input, shape index: {}]   ;;  %s3591_s3 = inlined_call_operand.hbm [shape: f32[2,4,8,8], index: 3, kind: input, shape index: {}]   ;;  %s3592_s4 = inlined_call_operand.hbm [shape: f32[4,8,8], index: 4, kind: input, shape index: {}]   ;;  %s3593_s5 = inlined_call_operand.hbm [shape: f32[4,8,8], index: 5, kind: input, shape index: {}]   ;;  %s3594_s6 = inlined_call_operand.hbm [shape: f32[4,8,8], index: 6, kind: input, shape index: {}]   ;;  %s3595_s7 = inlined_call_operand.hbm [shape: f32[4,8,32], index: 7, kind: input, shape index: {}]   ;;  %s3596_s8 = inlined_call_operand.vmem [shape: f32[1,32], index: 8, kind: input, shape index: {}]   ;;  %s3597_s9 = inlined_call_operand.hbm [shape: f32[2,8,32], index: 9, kind: output, shape index: {}]  }
   0x1   :  { %3615 = sst [smem:[#allocation29_spill]] %s3588_s0 }
   0x2   :  { %3616 = sst [smem:[#allocation30_spill]] %s3589_s1 }
   0x3   :  { %3617 = sst [smem:[#allocation31_spill]] %s3592_s4 }
   0x4   :  { %3618 = sst [smem:[#allocation32_spill]] %s3593_s5 }
   0x5   :  { %3619 = sst [smem:[#allocation33_spill]] %s3594_s6 }
   0x6   :  { %3620 = sst [smem:[#allocation34_spill]] %s3595_s7 }
   0x7   :  { %3621 = sst [smem:[#allocation35_spill]] %s3597_s9 }
   0x8   :  { %14 = vsyncpa [#allocation3], 0 }
   0x9   :  { %16 = vsyncpa [#allocation3 + $0x1], 0 }
   0xa   :  { %17 = vsyncpa [#allocation6], 0 }
   0xb   :  { %19 = vsyncpa [#allocation6 + $0x1], 0 }
   0xc   :  { %20 = vsyncpa [#allocation9], 0 }
   0xd   :  { %22 = vsyncpa [#allocation9 + $0x1], 0 }
   0xe   :  { %23 = vsyncpa [#allocation12], 0 }
   0xf   :  { %24 = vsyncpa [#allocation15], 0 }
  0x10   :  { %25 = vsyncpa [#allocation4], 0 }
  0x11   :  { %27 = vsyncpa [#allocation4 + $0x1], 0  ;;  %s3102_s30 = smov 0   ;;  %s3104_s10 = smov 0  }
  0x12   :  { %s3106_s11 = smov 0   ;;  %s3108_s12 = smov 0  }
  0x13 LB: > { %3622 = sst [smem:[#allocation24_spill]] %s3023_s30  ;;  %s3123_s13 = sadd.s32 4294967295, %s3035_s12   ;;  %s3035_s12 = sphi %s3108_s12, %s3661_s12   ;;  %s3031_s11 = sphi %s3106_s11, %s3663_s11   ;;  %s3027_s10 = sphi %s3104_s10, %s3665_s10   ;;  %s3023_s30 = sphi %s3102_s30, %s3664_s30  }
  0x14   : > { %3623 = sst [smem:[#allocation25_spill]] %s3031_s11  ;;  %s2364_s14 = sadd.s32 4294967294, %s3035_s12  }
  0x15   : > { %p53_p0 = scmp.ne.s32.totalorder %s3027_s10, %s3023_s30  ;;  %p3606_p1 = scmp.eq.s32.totalorder %s3123_s13, 0 }
  0x16   : > { %p260_p2 = scmp.eq.s32.totalorder %s3123_s13, 1  ;;  %p266_p3 = scmp.eq.s32.totalorder %s2364_s14, 1 }
  0x17   : > { %p3132_p4 = por %p3606_p1, %p53_p0  ;;  %p2365_p5 = scmp.ge.s32.totalorder %s3035_s12, 1 }
  0x18   : > { %p3137_p6 = por %p266_p3, %p53_p0  ;;  %p273_p7 = scmp.lt.s32.totalorder %s3035_s12, 3 }
  0x19   : > { %s3624_s15 = scalar_select %p3132_p4, 1, 0 }
  0x1a   : > { %s3625_s16 = scalar_select %p3137_p6, 1, 0 }
  0x1b   : > { %p3142_p8 = pnand %p2365_p5, %p273_p7  ;;  %s3037_s18 = smov [#allocation10]  }
  0x1c   : > { %3626 = sst [smem:[#allocation26_spill]] %s3625_s16  ;;  %s285_s19 = sshll.u32 %s3037_s18, 4  ;;  %s286_s19 = int_to_ptr.vmem [resolvable:$true] %s285_s19 }
  0x1d   : > { %s3627_s17 = scalar_select %p3142_p8, 1, 0 }
  0x1e   : > { %p2637_p9 = pneg %p3142_p8  ;;  %s3038_s21 = smov [#allocation11]  }
  0x1f   : > { %s298_s22 = sshll.u32 %s3038_s21, 4  ;;  %s2746_s23 = scalar_lea.vmem %s286_s19, 512  ;;  %s299_s22 = int_to_ptr.vmem [resolvable:$true] %s298_s22 }
  0x20   : > { %p3151_p11 = pnand %p2637_p9, %p3606_p1  ;;  %p2747_p13 = scmp.ne.s32.totalorder %s286_s19, %s2746_s23 }
  0x21   : > { %p2754_p5 = scmp.lt.s32.totalorder %s286_s19, %s286_s19  ;;  %p2755_p7 = scmp.lt.s32.totalorder %s2746_s23, %s2746_s23 }
  0x22   : > { %s3628_s20 = scalar_select %p3151_p11, 1, 0 }
  0x23   : > { %p3607_p12 = pneg %p3151_p11  ;;  %p2756_p10 = por %p2755_p7, %p2754_p5 }
  0x25   : > { %p2749_p0 = pnand %p2747_p13, %p3607_p12 }
  0x27   : > { %p2750_p3 = pneg %p2749_p0 }
  0x29   : > { %p2757_p9 = pnand %p2756_p10, %p2750_p3 }
  0x2b   : > { %2760 = shalt.err (!%p2757_p9)
}
  0x2c   : > { %s3598_s24 = smov 128   ;;  %s3600_s25 = smov 8  }
  0x2d   : > { %s3629_s4 = sld [smem:[#allocation31_spill]]  ;;  %s2772_s28 = scalar_lea.vmem %s299_s22, 512 }
  0x2e   : > { %p2773_p13 = scmp.ne.s32.totalorder %s299_s22, %s2772_s28  ;;  %p2780_p10 = scmp.lt.s32.totalorder %s299_s22, %s299_s22 }
  0x2f   : > { %p2781_p3 = scmp.lt.s32.totalorder %s2772_s28, %s2772_s28 }
  0x30   : > { %p2775_p0 = pnand %p2773_p13, %p3607_p12 }
  0x31   : > { %p2782_p7 = por %p2781_p3, %p2780_p10 }
  0x32   : > { %p2776_p5 = pneg %p2775_p0 }
  0x33   : > { %2640 = dma.hbm_to_vmem [thread:$0]  (!%p3151_p11), %s3629_s4, 512, %s286_s19, [#allocation9], %s3598_s24, %s3598_s24, %s3600_s25  }
  0x34   : > { %p2783_p9 = pnand %p2782_p7, %p2776_p5 }
  0x36   : > { %2786 = shalt.err (!%p2783_p9)
}
  0x37   : > { %s3630_s5 = sld [smem:[#allocation32_spill]]  ;;  %s3180_s18 = sadd.s32 1, %s3035_s12  }
  0x38   : > { %3631 = sst [smem:[#allocation27_spill]] %s3180_s18  ;;  %s40_s19 = sadd.s32 1, %s3031_s11 }
  0x39   : > { %s37_s21 = ssub.s32 %s3035_s12, %s3180_s18  ;;  %p47_p13 = scmp.ne.s32.totalorder %s3031_s11, %s3027_s10 }
  0x3a   : > { %p38_p0 = scmp.eq.s32.totalorder %s37_s21, 0  ;;  %p48_p5 = scmp.eq.s32.totalorder %s3035_s12, 0 }
  0x3b   : > { %p3190_p10 = por %p260_p2, %p47_p13  ;;  %p2671_p3 = scmp.lt.s32.totalorder %s3035_s12, 2 }
  0x3c   : > { %s3196_s26 = scalar_select %p38_p0, %s3031_s11, %s40_s19  }
  0x3d   : > { %2643 = dma.hbm_to_vmem [thread:$0]  (!%p3151_p11), %s3630_s5, 512, %s299_s22, [#allocation12], %s3598_s24, %s3598_s24, %s3600_s25  }
  0x3e   : > { %s3632_s23 = scalar_select %p3190_p10, 1, 0 }
  0x3f   : > { %3633 = sst [smem:[#allocation28_spill]] %s3196_s26  ;;  %p49_p7 = por %p48_p5, %p47_p13 }
  0x40   : > { %s3199_s27 = sand.u32 1, %s3031_s11   ;;  %s3210_s14 = sshll.u32 %s3035_s12, 9 }
  0x41   : > { %s3203_s28 = sshll.u32 %s3199_s27, 5  ;;  %p3205_p9 = pnand %p2671_p3, %p49_p7 }
  0x42   : > { %s3635_s1 = sld [smem:[#allocation30_spill]]  ;;  %s366_s25 = scalar_lea.vmem [#allocation5], %s3203_s28 }
  0x43   : > { %s373_s22 = sshll.u32 %s366_s25, 4  ;;  %s3636_s4 = sand.u32 1, %s3035_s12   ;;  %s3219_s22 = int_to_ptr.vmem [resolvable:$true] %s373_s22 }
  0x44   : > { %s3223_s5 = scalar_lea.sflag [#allocation6], %s3636_s4  ;;  %p3229_p13 = pneg %p3205_p9 }
  0x48   : > { %s3216_s19 = scalar_lea.hbm %s3635_s1, %s3210_s14  ;;  %s2792_s25 = scalar_lea.hbm %s3635_s1, 1024 }
  0x49   : > { %s2787_s26 = scalar_lea.hbm %s3216_s19, 512  ;;  %p2793_p3 = scmp.lt.s32.totalorder %s3216_s19, %s3635_s1 }
  0x4a   : > { %p2788_p2 = scmp.ne.s32.totalorder %s3216_s19, %s2787_s26  ;;  %p2794_p7 = scmp.lt.s32.totalorder %s2792_s25, %s2787_s26 }
  0x4c   : > { %p2790_p0 = pnand %p3229_p13, %p2788_p2  ;;  %p2795_p1 = por %p2794_p7, %p2793_p3 }
  0x4e   : > { %p2791_p5 = pneg %p2790_p0 }
  0x50   : > { %p2796_p12 = pnand %p2795_p1, %p2791_p5 }
  0x52   : > { %2799 = shalt.err (!%p2796_p12)
}
  0x53   : > { %s2800_s4 = scalar_lea.vmem %s3219_s22, 512  ;;  %s3041_s30 = smov [#allocation5]  }
  0x54   : > { %p2801_p6 = scmp.ne.s32.totalorder %s3219_s22, %s2800_s4  ;;  %s2805_s24 = sshll.u32 %s3041_s30, 4  ;;  %s2806_s24 = int_to_ptr.vmem [resolvable:$false] %s2805_s24 }
  0x55   : > { %s2807_s21 = scalar_lea.vmem %s2806_s24, 1024  ;;  %p2808_p10 = scmp.lt.s32.totalorder %s3219_s22, %s2806_s24 }
  0x56   : > { %p2803_p2 = pnand %p2801_p6, %p3229_p13  ;;  %p2809_p4 = scmp.lt.s32.totalorder %s2807_s21, %s2800_s4 }
  0x58   : > { %p2804_p0 = pneg %p2803_p2  ;;  %p2810_p8 = por %p2809_p4, %p2808_p10 }
  0x5a   : > { %p2811_p11 = pnand %p2810_p8, %p2804_p0 }
  0x5c   : > { %2814 = shalt.err (!%p2811_p11)
}
  0x5d   : > { %s3638_s16 = smov 8   ;;  %s3639_s18 = smov 128  }
  0x5e   : > { %2656 = dma.hbm_to_vmem [thread:$0]  (!%p3205_p9), %s3216_s19, 512, %s3219_s22, %s3223_s5, %s3639_s18, %s3639_s18, %s3638_s16  }
  0x5f   : > { %s3042_s26 = smov [#allocation13]   ;;  %s3043_s30 = smov [#allocation14]  }
  0x60   : > { %s311_s25 = sshll.u32 %s3042_s26, 4  ;;  %s324_s1 = sshll.u32 %s3043_s30, 4  ;;  %s312_s25 = int_to_ptr.vmem [resolvable:$true] %s311_s25  ;;  %s325_s1 = int_to_ptr.vmem [resolvable:$true] %s324_s1 }
  0x61   : > { %s2826_s24 = scalar_lea.vmem %s312_s25, 512  ;;  %p3640_p4 = scmp.ne.s32.totalorder %s3628_s20, 0 }
  0x62   : > { %p2827_p1 = scmp.ne.s32.totalorder %s312_s25, %s2826_s24  ;;  %p2834_p12 = scmp.lt.s32.totalorder %s312_s25, %s312_s25 }
  0x63   : > { %p3641_p6 = pneg %p3640_p4  ;;  %p2835_p10 = scmp.lt.s32.totalorder %s2826_s24, %s2826_s24 }
  0x65   : > { %p2829_p8 = pnand %p2827_p1, %p3641_p6  ;;  %p2836_p5 = por %p2835_p10, %p2834_p12 }
  0x67   : > { %p2830_p11 = pneg %p2829_p8 }
  0x69   : > { %p2837_p3 = pnand %p2836_p5, %p2830_p11 }
  0x6b   : > { %2840 = shalt.err (!%p2837_p3)
}
  0x6c   : > { %s3642_s6 = sld [smem:[#allocation33_spill]]  ;;  %s2852_s4 = scalar_lea.vmem %s325_s1, 512 }
  0x6d   : > { %p2853_p7 = scmp.ne.s32.totalorder %s325_s1, %s2852_s4  ;;  %p3643_p2 = pmov %p3641_p6 }
  0x6e   : > { %p2860_p6 = scmp.lt.s32.totalorder %s325_s1, %s325_s1  ;;  %p2861_p8 = scmp.lt.s32.totalorder %s2852_s4, %s2852_s4 }
  0x6f   : > { %p2855_p0 = pnand %p2853_p7, %p3643_p2 }
  0x70   : > { %p2862_p11 = por %p2861_p8, %p2860_p6 }
  0x71   : > { %p2856_p1 = pneg %p2855_p0 }
  0x72   : > { %2646 = dma.hbm_to_vmem [thread:$0]  (!%p3640_p4), %s3642_s6, 512, %s312_s25, [#allocation12], %s3639_s18, %s3639_s18, %s3638_s16  }
  0x73   : > { %p2863_p12 = pnand %p2862_p11, %p2856_p1 }
  0x75   : > { %2866 = shalt.err (!%p2863_p12)
}
  0x76   : > { %s3644_s7 = sld [smem:[#allocation34_spill]]  ;;  %s2371_s25 = sshll.u32 %s3199_s27, 4 }
  0x77   : > { %s2422_s30 = sshll.u32 %s3035_s12, 8  ;;  %s3645_s0 = sld [smem:[#allocation29_spill]] }
  0x78   : > { %s345_s20 = scalar_lea.vmem [#allocation2], %s2371_s25  ;;  %s342_s21 = scalar_lea.sflag [#allocation3], %s3199_s27 }
  0x79   : > { %s352_s4 = sshll.u32 %s345_s20, 4  ;;  %s3284_s4 = int_to_ptr.vmem [resolvable:$true] %s352_s4 }
  0x7c   : > { %2649 = dma.hbm_to_vmem [thread:$0]  (!%p3640_p4), %s3644_s7, 512, %s325_s1, [#allocation15], %s3639_s18, %s3639_s18, %s3638_s16  }
  0x7d   : > { %s3282_s19 = scalar_lea.hbm %s3645_s0, %s2422_s30  ;;  %s2872_s7 = scalar_lea.hbm %s3645_s0, 512 }
  0x7e   : > { %s2867_s26 = scalar_lea.hbm %s3282_s19, 256  ;;  %p2873_p3 = scmp.lt.s32.totalorder %s3282_s19, %s3645_s0 }
  0x7f   : > { %p2868_p10 = scmp.ne.s32.totalorder %s3282_s19, %s2867_s26  ;;  %p2874_p7 = scmp.lt.s32.totalorder %s2872_s7, %s2867_s26 }
  0x81   : > { %p2870_p5 = pnand %p2868_p10, %p3229_p13  ;;  %p2875_p2 = por %p2874_p7, %p2873_p3 }
  0x83   : > { %p2871_p4 = pneg %p2870_p5 }
  0x85   : > { %p2876_p0 = pnand %p2875_p2, %p2871_p4 }
  0x87   : > { %2879 = shalt.err (!%p2876_p0)
}
  0x88   : > { %s2880_s25 = scalar_lea.vmem %s3284_s4, 256  ;;  %s3044_s22 = smov [#allocation2]  }
  0x89   : > { %p2881_p1 = scmp.ne.s32.totalorder %s3284_s4, %s2880_s25  ;;  %s2885_s6 = sshll.u32 %s3044_s22, 4  ;;  %s2886_s6 = int_to_ptr.vmem [resolvable:$false] %s2885_s6 }
  0x8a   : > { %s2887_s20 = scalar_lea.vmem %s2886_s6, 512  ;;  %p2888_p11 = scmp.lt.s32.totalorder %s3284_s4, %s2886_s6 }
  0x8b   : > { %p2883_p6 = pnand %p2881_p1, %p3229_p13  ;;  %p2889_p12 = scmp.lt.s32.totalorder %s2887_s20, %s2880_s25 }
  0x8d   : > { %p2884_p8 = pneg %p2883_p6  ;;  %p2890_p10 = por %p2889_p12, %p2888_p11 }
  0x8f   : > { %p2891_p5 = pnand %p2890_p10, %p2884_p8 }
  0x91   : > { %2894 = shalt.err (!%p2891_p5)
}
  0x92   : > { %s3045_s7 = smov 64   ;;  %s3046_s26 = smov 4  }
  0x93   : > { %2653 = dma.hbm_to_vmem [thread:$0]  (!%p3205_p9), %s3282_s19, 256, %s3284_s4, %s342_s21, %s3045_s7, %s3045_s7, %s3046_s26  }
  0x94   : > { %s3313_s30 = scalar_lea.hbm %s3590_s2, %s3210_s14  ;;  %s387_s25 = scalar_lea.vmem [#allocation7], %s3203_s28 }
  0x95   : > { %s394_s22 = sshll.u32 %s387_s25, 4  ;;  %s3322_s0 = scalar_lea.hbm %s3591_s3, %s3210_s14  ;;  %s3316_s22 = int_to_ptr.vmem [resolvable:$true] %s394_s22 }
  0x96   : > { %s2895_s9 = scalar_lea.hbm %s3313_s30, 512  ;;  %s2900_s4 = scalar_lea.hbm %s3590_s2, 1024 }
  0x97   : > { %p2896_p4 = scmp.ne.s32.totalorder %s3313_s30, %s2895_s9  ;;  %p2901_p2 = scmp.lt.s32.totalorder %s3313_s30, %s3590_s2 }
  0x98   : > { %p2902_p0 = scmp.lt.s32.totalorder %s2900_s4, %s2895_s9 }
  0x99   : > { %p2898_p3 = pnand %p2896_p4, %p3229_p13 }
  0x9a   : > { %p2903_p1 = por %p2902_p0, %p2901_p2 }
  0x9b   : > { %p2899_p7 = pneg %p2898_p3 }
  0x9d   : > { %p2904_p6 = pnand %p2903_p1, %p2899_p7 }
  0x9f   : > { %2907 = shalt.err (!%p2904_p6)
}
  0xa0   : > { %s2908_s14 = scalar_lea.vmem %s3316_s22, 512  ;;  %s3047_s26 = smov [#allocation7]  }
  0xa1   : > { %p2909_p8 = scmp.ne.s32.totalorder %s3316_s22, %s2908_s14  ;;  %s2913_s1 = sshll.u32 %s3047_s26, 4  ;;  %s2914_s1 = int_to_ptr.vmem [resolvable:$false] %s2913_s1 }
  0xa2   : > { %s2915_s24 = scalar_lea.vmem %s2914_s1, 1024  ;;  %p2916_p10 = scmp.lt.s32.totalorder %s3316_s22, %s2914_s1 }
  0xa3   : > { %p2911_p11 = pnand %p2909_p8, %p3229_p13  ;;  %p2917_p5 = scmp.lt.s32.totalorder %s2915_s24, %s2908_s14 }
  0xa5   : > { %p2912_p12 = pneg %p2911_p11  ;;  %p2918_p4 = por %p2917_p5, %p2916_p10 }
  0xa7   : > { %p2919_p3 = pnand %p2918_p4, %p2912_p12 }
  0xa9   : > { %2922 = shalt.err (!%p2919_p3)
}
  0xaa   : > { %2659 = dma.hbm_to_vmem [thread:$0]  (!%p3205_p9), %s3313_s30, 512, %s3316_s22, %s3223_s5, %s3639_s18, %s3639_s18, %s3638_s16  }
  0xab   : > { %s408_s9 = scalar_lea.vmem [#allocation8], %s3203_s28  ;;  %s3646_s6 = sand.u32 1, %s3035_s12  }
  0xac   : > { %s415_s25 = sshll.u32 %s408_s9, 4  ;;  %s405_s20 = scalar_lea.sflag [#allocation9], %s3646_s6  ;;  %s3349_s25 = int_to_ptr.vmem [resolvable:$true] %s415_s25 }
  0xad   : > { %s2923_s27 = scalar_lea.hbm %s3322_s0, 512  ;;  %s2928_s21 = scalar_lea.hbm %s3591_s3, 1024 }
  0xae   : > { %p2924_p7 = scmp.ne.s32.totalorder %s3322_s0, %s2923_s27  ;;  %p2929_p1 = scmp.lt.s32.totalorder %s3322_s0, %s3591_s3 }
  0xaf   : > { %p2930_p6 = scmp.lt.s32.totalorder %s2928_s21, %s2923_s27 }
  0xb0   : > { %p2926_p2 = pnand %p2924_p7, %p3229_p13 }
  0xb1   : > { %p2931_p8 = por %p2930_p6, %p2929_p1 }
  0xb2   : > { %p2927_p0 = pneg %p2926_p2 }
  0xb4   : > { %p2932_p11 = pnand %p2931_p8, %p2927_p0 }
  0xb6   : > { %2935 = shalt.err (!%p2932_p11)
}
  0xb7   : > { %s2936_s5 = scalar_lea.vmem %s3349_s25, 512  ;;  %s3048_s28 = smov [#allocation8]  }
  0xb8   : > { %p2937_p12 = scmp.ne.s32.totalorder %s3349_s25, %s2936_s5  ;;  %s2941_s30 = sshll.u32 %s3048_s28, 4  ;;  %s2942_s30 = int_to_ptr.vmem [resolvable:$false] %s2941_s30 }
  0xb9   : > { %s2943_s22 = scalar_lea.vmem %s2942_s30, 1024  ;;  %p2944_p4 = scmp.lt.s32.totalorder %s3349_s25, %s2942_s30 }
  0xba   : > { %p2939_p10 = pnand %p2937_p12, %p3229_p13  ;;  %p2945_p3 = scmp.lt.s32.totalorder %s2943_s22, %s2936_s5 }
  0xbc   : > { %p2940_p5 = pneg %p2939_p10  ;;  %p2946_p7 = por %p2945_p3, %p2944_p4 }
  0xbe   : > { %p2947_p2 = pnand %p2946_p7, %p2940_p5 }
  0xc0   : > { %2950 = shalt.err (!%p2947_p2)
}
  0xc1   : > { %2662 = dma.hbm_to_vmem [thread:$0]  (!%p3205_p9), %s3322_s0, 512, %s3349_s25, %s405_s20, %s3639_s18, %s3639_s18, %s3638_s16  }
  0xc2   : > { %p3647_p13 = scmp.ne.s32.totalorder %s3627_s17, 0 }
  0xc3   : > { %s3379_s11 = sand.u32 (!%p3647_p13), 1, %s3027_s10   ;;  %p3648_p0 = scmp.ne.s32.totalorder (!%p3647_p13), %s3624_s15, 0 }
  0xc4   : > { %427 = sbr.rel (%p3647_p13) target bundleno = 1357 (0x54d), region = 56  ;;  %s2384_s26 = sshll.u32 (!%p3647_p13), %s3379_s11, 4 }
  0xc5   : > { %s430_s1 = scalar_lea.sflag (!%p3647_p13), [#allocation3], %s3379_s11  ;;  %s3383_s24 = scalar_lea.vmem (!%p3647_p13), [#allocation2], %s2384_s26 }
  0xc9   : > { %2994 = dma.done.wait (%p3648_p0), %s430_s1, 256  }
  0xca   : > { %2996 = vsyncadd (%p3648_p0), %s430_s1, 4294967040  ;;  %s438_s0 = sand.u32 1, %s3123_s13   ;;  %s2385_s17 = sshll.u32 %s3379_s11, 5 }
  0xcb   : > { %s439_s29 = scalar_lea.sflag [#allocation6], %s438_s0  ;;  %s3391_s16 = scalar_lea.vmem [#allocation5], %s2385_s17 }
  0xcc   : > { %2998 = dma.done.wait (%p3648_p0), %s439_s29, 1024  }
  0xcd   : > { %3000 = vsyncadd (%p3648_p0), %s439_s29, 4294966272  ;;  %s3397_s18 = scalar_lea.vmem [#allocation7], %s2385_s17  ;;  %s457_s9 = scalar_lea.sflag [#allocation9], %s438_s0 }
  0xce   : > { %s3399_s25 = scalar_lea.vmem [#allocation8], %s2385_s17 }
  0xcf   : > { %3002 = dma.done.wait (%p3648_p0), %s457_s9, 512  }
  0xd0   : > { %3004 = vsyncadd (%p3648_p0), %s457_s9, 4294966784  ;;  %p3649_p9 = scmp.eq.s32.totalorder %s3123_s13, 0 }
  0xd2   : > { %3006 = dma.done.wait (%p3649_p9), [#allocation9], 512   ;;  %p3650_p1 = pmov %p3649_p9 }
  0xd4   : > { %3008 = vsyncadd (%p3650_p1), [#allocation9], 4294966784  ;;  %p3651_p6 = pmov %p3650_p1 }
  0xd5   : > { %p3652_p8 = pmov %p3650_p1 }
  0xd6   : > { %3010 = dma.done.wait (%p3651_p6), [#allocation12], 1024  }
  0xd7   : > { %3012 = vsyncadd (%p3652_p8), [#allocation12], 4294966272  ;;  %p3653_p11 = pmov %p3650_p1 }
  0xd8   : > { %p3654_p12 = pmov %p3650_p1 }
  0xd9   : > { %3014 = dma.done.wait (%p3653_p11), [#allocation15], 512  }
  0xda   : > { %3016 = vsyncadd (%p3654_p12), [#allocation15], 4294966784  ;;  %v3049_v0 = vmov 0.0   ;;  %vm3050_vm0 = vmmov 0   ;;  %vm543_vm1 = vcmask 64512   ;;  %v539_v1 = vld [vmem:[#allocation10] sm:$0xff] }
  0xdb   : > { %2483 = vmatprep.subr.mxu0 %v3049_v0  ;;  %2488 = vmatprep.subr.mxu1 %v3049_v0  ;;  %v540_v2 = vld [vmem:[#allocation10 + $0x8] sm:$0xff]  ;;  %v527_v3 = vld [vmem:[%s3391_s16] sm:$0xff]  ;;  %v541_v5 = vld [vmem:[#allocation10 + $0x10] sm:$0xff]  ;;  %vm1683_vm2 = vcmask 1043456   ;;  %s2392_s15 = sshll.u32 %s3379_s11, 3  ;;  %s2419_s27 = sshll.u32 %s3123_s13, 7 }
  0xdc   : > { %2485 = vmatprep.mubr.msk.f32.mxu0 %vm3050_vm0, %v3049_v0  ;;  %2490 = vmatprep.mubr.msk.f32.mxu1 %vm3050_vm0, %v3049_v0  ;;  %v528_v4 = vld [vmem:[%s3391_s16 + $0x8] sm:$0xff]  ;;  %v542_v6 = vld [vmem:[#allocation10 + $0x18] sm:$0xff]  ;;  %v529_v7 = vld [vmem:[%s3391_s16 + $0x10] sm:$0xff]  ;;  %s525_s19 = scalar_lea.vmem [#allocation16], %s2392_s15  ;;  %vm2174_vm3 = vcmask 261120   ;;  %s3655_s14 = sld [smem:[#allocation35_spill]] }
  0xdd   : > { %2484 = vmatpush3.msra.mxu0 %v539_v1  ;;  %2489 = vmatpush3.msra.mxu1 %v540_v2  ;;  %v530_v8 = vld [vmem:[%s3391_s16 + $0x18] sm:$0xff]  ;;  %v836_v9 = vld [vmem:[#allocation11] sm:$0xff]  ;;  %v837_v10 = vld [vmem:[#allocation11 + $0x8] sm:$0xff]  ;;  %s2190_s4 = sshll.u32 %s525_s19, 4  ;;  %s2177_s28 = scalar_lea.sflag [#allocation4], %s3379_s11  ;;  %s2191_s4 = int_to_ptr.vmem [resolvable:$true] %s2190_s4 }
  0xde   : > { %2486 = vmatmul.mubr.msk.f32.vlgmr.msra.gmra.mxu0 %vm543_vm1, %v527_v3  ;;  %2491 = vmatmul.mubr.msk.f32.vlgmr.msra.gmra.mxu1 %vm543_vm1, %v528_v4  ;;  %v531_v11 = vld [vmem:[%s3397_s18] sm:$0xff]  ;;  %v532_v12 = vld [vmem:[%s3397_s18 + $0x8] sm:$0xff]  ;;  %v838_v13 = vld [vmem:[#allocation11 + $0x10] sm:$0xff]  ;;  %s2951_s30 = scalar_lea.vmem %s2191_s4, 128  ;;  %p3656_p5 = scmp.ne.s32.totalorder %s3632_s23, 0 }
  0xdf   : > { %2493 = vmatprep.subr.mxu0 %v3049_v0  ;;  %2498 = vmatprep.subr.mxu1 %v3049_v0  ;;  %v839_v14 = vld [vmem:[#allocation11 + $0x18] sm:$0xff]  ;;  %v533_v15 = vld [vmem:[%s3397_s18 + $0x10] sm:$0xff]  ;;  %v1132_v17 = vld [vmem:[#allocation13] sm:$0xff]  ;;  %p2952_p10 = scmp.ne.s32.totalorder %s2191_s4, %s2951_s30  ;;  %s3051_s22 = smov [#allocation16]  }
  0xe0   : > { %2494 = vmatpush3.msra.mxu0 %v541_v5  ;;  %2495 = vmatprep.mubr.msk.f32.mxu0 %vm3050_vm0, %v3049_v0  ;;  %v534_v16 = vld [vmem:[%s3397_s18 + $0x18] sm:$0xff]  ;;  %v1133_v18 = vld [vmem:[#allocation13 + $0x8] sm:$0xff]  ;;  %v535_v19 = vld [vmem:[%s3399_s25] sm:$0xff]  ;;  %s2955_s13 = sshll.u32 %s3051_s22, 4  ;;  %s2956_s13 = int_to_ptr.vmem [resolvable:$false] %s2955_s13 }
  0xe1   : > { %2499 = vmatpush3.msra.mxu1 %v542_v6  ;;  %2500 = vmatprep.mubr.msk.f32.mxu1 %vm3050_vm0, %v3049_v0  ;;  %v536_v20 = vld [vmem:[%s3399_s25 + $0x8] sm:$0xff]  ;;  %v1134_v21 = vld [vmem:[#allocation13 + $0x10] sm:$0xff]  ;;  %v1135_v22 = vld [vmem:[#allocation13 + $0x18] sm:$0xff]  ;;  %p2953_p4 = pnand %p2952_p10, %p3656_p5  ;;  %s2957_s26 = scalar_lea.vmem %s2956_s13, 256 }
  0xe2   : > { %2496 = vmatmul.mubr.msk.f32.vlgmr.msra.gmra.mxu0 %vm543_vm1, %v529_v7  ;;  %2501 = vmatmul.mubr.msk.f32.vlgmr.msra.gmra.mxu1 %vm543_vm1, %v530_v8  ;;  %v537_v23 = vld [vmem:[%s3399_s25 + $0x10] sm:$0xff]  ;;  %v538_v24 = vld [vmem:[%s3399_s25 + $0x18] sm:$0xff]  ;;  %s2188_s5 = scalar_lea.hbm %s3655_s14, %s2419_s27  ;;  %p2958_p7 = scmp.lt.s32.totalorder %s2191_s4, %s2956_s13 }
  0xe3   : > { %2503 = vmatprep.subr.mxu0 %v3049_v0  ;;  %2508 = vmatprep.subr.mxu1 %v3049_v0  ;;  %v2427_v6 = vld [vmem:[%s3383_s24] sm:$0xff]   ;;  %p2954_p3 = pneg %p2953_p4  ;;  %p2959_p2 = scmp.lt.s32.totalorder %s2957_s26, %s2951_s30 }
  0xe4   : > { %2504 = vmatpush3.msra.mxu0 %v836_v9  ;;  %2505 = vmatprep.mubr.msk.f32.mxu0 %vm3050_vm0, %v3049_v0  ;;  %v2428_v7 = vunpack.c.l.bf16 %v2427_v6  ;;  %v2429_v8 = vunpack.c.h.bf16 %v2427_v6 }
  0xe5   : > { %2509 = vmatpush3.msra.mxu1 %v837_v10  ;;  %2510 = vmatprep.mubr.msk.f32.mxu1 %vm3050_vm0, %v3049_v0  ;;  %p2960_p13 = por %p2959_p2, %p2958_p7 }
  0xe6   : > { %2506 = vmatmul.mubr.msk.f32.vlgmr.msra.gmra.mxu0 %vm543_vm1, %v531_v11  ;;  %2511 = vmatmul.mubr.msk.f32.vlgmr.msra.gmra.mxu1 %vm543_vm1, %v532_v12 }
  0xe7   : > { %2513 = vmatprep.subr.mxu0 %v3049_v0  ;;  %2518 = vmatprep.subr.mxu1 %v3049_v0  ;;  %p2961_p0 = pnand %p2960_p13, %p2954_p3 }
  0xe8   : > { %2514 = vmatpush3.msra.mxu0 %v838_v13  ;;  %2515 = vmatprep.mubr.msk.f32.mxu0 %vm3050_vm0, %v3049_v0 }
  0xe9   : > { %2519 = vmatpush3.msra.mxu1 %v839_v14  ;;  %2520 = vmatprep.mubr.msk.f32.mxu1 %vm3050_vm0, %v3049_v0 }
  0xea   : > { %2516 = vmatmul.mubr.msk.f32.vlgmr.msra.gmra.mxu0 %vm543_vm1, %v533_v15  ;;  %2521 = vmatmul.mubr.msk.f32.vlgmr.msra.gmra.mxu1 %vm543_vm1, %v534_v16  ;;  %v2434_v15 = vld [vmem:[%s3383_s24 + $0x8] sm:$0xff]  }
  0xeb   : > { %2523 = vmatprep.subr.mxu0 %v3049_v0  ;;  %2528 = vmatprep.subr.mxu1 %v3049_v0 }
  0xec   : > { %2524 = vmatpush3.msra.mxu0 %v1132_v17  ;;  %2525 = vmatprep.mubr.msk.f32.mxu0 %vm3050_vm0, %v3049_v0 }
  0xed   : > { %2529 = vmatpush3.msra.mxu1 %v1133_v18  ;;  %2530 = vmatprep.mubr.msk.f32.mxu1 %vm3050_vm0, %v3049_v0 }
  0xee   : > { %2526 = vmatmul.mubr.msk.f32.vlgmr.msra.gmra.mxu0 %vm543_vm1, %v535_v19  ;;  %2531 = vmatmul.mubr.msk.f32.vlgmr.msra.gmra.mxu1 %vm543_vm1, %v536_v20  ;;  %v2433_v19 = vunpack.c.h.bf16 %v2434_v15 }
  0xef   : > { %2533 = vmatprep.subr.mxu0 %v3049_v0  ;;  %2535 = vmatprep.mubr.msk.f32.mxu0 %vm3050_vm0, %v3049_v0 }
  0xf0   : > { %2534 = vmatpush3.msra.mxu0 %v1134_v21  ;;  %2538 = vmatprep.subr.mxu1 %v3049_v0  ;;  %v2432_v21 = vunpack.c.l.bf16 %v2434_v15 }
  0xf1   : > { %2539 = vmatpush3.msra.mxu1 %v1135_v22  ;;  %2540 = vmatprep.mubr.msk.f32.mxu1 %vm3050_vm0, %v3049_v0 }
  0xf2   : > { %2536 = vmatmul.mubr.msk.f32.vlgmr.msra.gmra.mxu0 %vm543_vm1, %v537_v23  ;;  %2541 = vmatmul.mubr.msk.f32.vlgmr.msra.gmra.mxu1 %vm543_vm1, %v538_v24 }
  0xf3   : > { %2543 = vmatprep.subr.bf16.mxu0 %v3049_v0  ;;  %2549 = vmatprep.subr.bf16.mxu1 %v3049_v0 }
  0xf4   : > { %2545 = vmatprep.mubr.msk.bf16.mxu0 %vm3050_vm0, %v3049_v0  ;;  %2551 = vmatprep.mubr.msk.bf16.mxu1 %vm3050_vm0, %v3049_v0 }
 0x19e   : > { %v613_v25 = vpop.f32.mrf.mxu0  ;;  %v686_v26 = vpop.f32.mrf.mxu1 }
 0x19f   : > { %v1676_v63 = vpack.c.bf16 %v613_v25, %v613_v25  ;;  %v1677_v1 = vpack.c.bf16 %v686_v26, %v686_v26 }
 0x1a0   : > { %v2487_v27 = vpop.f32.mrf.mxu0  ;;  %v2492_v28 = vpop.f32.mrf.mxu1 }
 0x1a1   : > { %v1685_v4 = vsel %vm1683_vm2, %v1676_v63, 0  ;;  %v1731_v5 = vsel %vm1683_vm2, %v1677_v1, 0 }
 0x1a2   : > { %v759_v29 = vpop.f32.mrf.mxu0  ;;  %v832_v30 = vpop.f32.mrf.mxu1 }
 0x1a3   : > { %v1678_v31 = vpack.c.bf16 %v759_v29, %v759_v29  ;;  %v1679_v32 = vpack.c.bf16 %v832_v30, %v832_v30 }
 0x1a4   : > { %v2497_v33 = vpop.f32.mrf.mxu0  ;;  %v2502_v34 = vpop.f32.mrf.mxu1 }
 0x1a5   : > { %v3484_v35 = vsel %vm1683_vm2, %v1678_v31, 0  ;;  %v3487_v36 = vsel %vm1683_vm2, %v1679_v32, 0 }
 0x1a6   : > { %v909_v37 = vpop.f32.mrf.mxu0  ;;  %v982_v38 = vpop.f32.mrf.mxu1 }
 0x1a7   : > { %v1432_v39 = vpack.c.bf16 %v909_v37, %v909_v37  ;;  %v1433_v40 = vpack.c.bf16 %v982_v38, %v982_v38 }
 0x1a8   : > { %v2507_v41 = vpop.f32.mrf.mxu0  ;;  %v2512_v42 = vpop.f32.mrf.mxu1 }
 0x1a9   : > { %v1448_v43 = vsel %vm543_vm1, %v1432_v39, 0  ;;  %v1494_v44 = vsel %vm543_vm1, %v1433_v40, 0 }
 0x1aa   : > { %v1055_v45 = vpop.f32.mrf.mxu0  ;;  %v1128_v46 = vpop.f32.mrf.mxu1  ;;  %2544 = vmatpush3.bf16.xpose.msra.mxu0 %v1448_v43  ;;  %2550 = vmatpush3.bf16.xpose.msra.mxu1 %v1494_v44 }
 0x1ab   : > { %v1435_v47 = vpack.c.bf16 %v1128_v46, %v1128_v46  ;;  %2555 = vmatprep.subr.bf16.mxu0 %v3049_v0  ;;  %2561 = vmatprep.subr.bf16.mxu1 %v3049_v0  ;;  %v1434_v50 = vpack.c.bf16 %v1055_v45, %v1055_v45 }
 0x1ac   : > { %v2517_v48 = vpop.f32.mrf.mxu0  ;;  %v2522_v49 = vpop.f32.mrf.mxu1 }
 0x1ad   : > { %v1586_v53 = vsel %vm543_vm1, %v1435_v47, 0  ;;  %v1540_v58 = vsel %vm543_vm1, %v1434_v50, 0 }
 0x1ae   : > { %v1205_v51 = vpop.f32.mrf.mxu0  ;;  %v1278_v52 = vpop.f32.mrf.mxu1 }
 0x1af   : > { %v1428_v54 = vpack.c.bf16 %v1205_v51, %v1205_v51  ;;  %v1429_v55 = vpack.c.bf16 %v1278_v52, %v1278_v52 }
 0x1b0   : > { %v2527_v56 = vpop.f32.mrf.mxu0  ;;  %v2532_v57 = vpop.f32.mrf.mxu1 }
 0x1b1   : > { %2546 = vmatmul.mubr.msk.bf16.vlgmr.msra.gmra.mxu0 %vm543_vm1, %v1428_v54  ;;  %2552 = vmatmul.mubr.msk.bf16.vlgmr.msra.gmra.mxu1 %vm543_vm1, %v1429_v55 }
 0x1b2   : > { %2556 = vmatpush3.bf16.xpose.msra.mxu0 %v1540_v58  ;;  %2562 = vmatpush3.bf16.xpose.msra.mxu1 %v1586_v53  ;;  %v1351_v59 = vpop.f32.mrf.mxu0  ;;  %v1424_v60 = vpop.f32.mrf.mxu1 }
 0x1b3   : > { %2557 = vmatprep.mubr.msk.bf16.mxu0 %vm3050_vm0, %v3049_v0  ;;  %2563 = vmatprep.mubr.msk.bf16.mxu1 %vm3050_vm0, %v3049_v0  ;;  %v1430_v2 = vpack.c.bf16 %v1351_v59, %v1351_v59  ;;  %v1431_v3 = vpack.c.bf16 %v1424_v60, %v1424_v60 }
 0x1b4   : > { %v2537_v61 = vpop.f32.mrf.mxu0  ;;  %2567 = vmatprep.subr.bf16.mxu0 %v3049_v0  ;;  %2573 = vmatprep.subr.bf16.mxu1 %v3049_v0  ;;  %v2542_v62 = vpop.f32.mrf.mxu1 }
 0x1b9   : > { %2558 = vmatmul.mubr.msk.bf16.vlgmr.msra.gmra.mxu0 %vm543_vm1, %v1430_v2  ;;  %2564 = vmatmul.mubr.msk.bf16.vlgmr.msra.gmra.mxu1 %vm543_vm1, %v1431_v3 }
 0x1ba   : > { %2568 = vmatpush3.bf16.msra.mxu0 %v1685_v4  ;;  %2574 = vmatpush3.bf16.msra.mxu1 %v1731_v5 }
 0x1bb   : > { %2569 = vmatprep.mubr.msk.bf16.mxu0 %vm3050_vm0, %v3049_v0  ;;  %2579 = vmatprep.subr.bf16.mxu0 %v3049_v0 }
 0x1bc   : > { %2575 = vmatprep.mubr.msk.bf16.mxu1 %vm3050_vm0, %v3049_v0  ;;  %2585 = vmatprep.subr.bf16.mxu1 %v3049_v0 }
 0x271   : > { %v1484_v9 = vpop.f32.mrf.mxu0  ;;  %v1530_v10 = vpop.f32.mrf.mxu1 }
 0x272   : > { %v1485_v11 = vadd.f32 %v2428_v7, %v1484_v9  ;;  %v1531_v12 = vadd.f32 %v2429_v8, %v1530_v10  ;;  %v1865_v10 = vld [vmem:[#allocation14] sm:$0xff] }
 0x273   : > { %v2547_v13 = vpop.f32.mrf.mxu0  ;;  %v2553_v14 = vpop.f32.mrf.mxu1 }
 0x274   : > { %v1628_v16 = vsel %vm543_vm1, %v1485_v11, -inf  ;;  %v1631_v20 = vsel %vm543_vm1, %v1531_v12, -inf  ;;  %v2015_v14 = vld [vmem:[#allocation14 + $0x10] sm:$0xff] }
 0x275   : > { %v1533_v17 = vpop.f32.mrf.mxu1  ;;  %1629 = vmax.xlane.f32.xlu0 %v1628_v16  ;;  %v1487_v18 = vpop.f32.mrf.mxu0 }
 0x277   : > { %v2548_v22 = vpop.f32.mrf.mxu0  ;;  %v2554_v23 = vpop.f32.mrf.mxu1 }
 0x279   : > { %v1622_v24 = vpop.f32.mrf.mxu1  ;;  %1632 = vmax.xlane.f32.xlu0 %v1631_v20  ;;  %v1576_v25 = vpop.f32.mrf.mxu0 }
 0x27a   : > { %v1623_v26 = vadd.f32 %v2433_v19, %v1622_v24  ;;  %v1577_v27 = vadd.f32 %v2432_v21, %v1576_v25 }
 0x27b   : > { %v2559_v28 = vpop.f32.mrf.mxu0  ;;  %v2565_v29 = vpop.f32.mrf.mxu1 }
 0x27c   : > { %v1634_v30 = vsel %vm543_vm1, %v1577_v27, -inf  ;;  %v1637_v33 = vsel %vm543_vm1, %v1623_v26, -inf }
 0x27d   : > { %v1625_v31 = vpop.f32.mrf.mxu1  ;;  %1635 = vmax.xlane.f32.xlu1 %v1634_v30  ;;  %v1579_v32 = vpop.f32.mrf.mxu0 }
 0x27f   : > { %v2560_v34 = vpop.f32.mrf.mxu0  ;;  %v2566_v37 = vpop.f32.mrf.mxu1 }
 0x281   : > { %1638 = vmax.xlane.f32.xlu1 %v1637_v33 }
 0x2fe   : > { %v1630_v38 = vpop.xlane.xlu0 %1629 }
 0x2ff   : > { %v1640_v39 = vsub.f32 %v1485_v11, %v1630_v38  ;;  %v2091_v11 = vld [vmem:[#allocation14 + $0x18] sm:$0xff] }
 0x301   : > { %v1644_v40 = vmul.f32 1.442695, %v1640_v39  ;;  %v2417_v39 = vld [vmem:[%s3596_s8] ss:$0 sm:$0xff] }
 0x302   : > { %v1633_v41 = vpop.xlane.xlu0 %1632 }
 0x303   : > { %2719 = vpow2.f32 %v1644_v40  ;;  %v1641_v42 = vsub.f32 %v1531_v12, %v1633_v41 }
 0x305   : > { %v1646_v43 = vmul.f32 1.442695, %v1641_v42 }
 0x306   : > { %v1636_v44 = vpop.xlane.xlu1 %1635 }
 0x307   : > { %2721 = vpow2.f32 %v1646_v43  ;;  %v1642_v45 = vsub.f32 %v1577_v27, %v1636_v44 }
 0x309   : > { %v1648_v46 = vmul.f32 1.442695, %v1642_v45 }
 0x30a   : > { %v1639_v47 = vpop.xlane.xlu1 %1638 }
 0x30b   : > { %2723 = vpow2.f32 %v1648_v46  ;;  %v1643_v48 = vsub.f32 %v1623_v26, %v1639_v47 }
 0x30d   : > { %v1650_v49 = vmul.f32 1.442695, %v1643_v48 }
 0x30f   : > { %2725 = vpow2.f32 %v1650_v49 }
 0x310   : > { %v2720_v50 = vpop.eup %2719 }
 0x311   : > { %v1652_v51 = vsel %vm543_vm1, %v2720_v50, 0.0 }
 0x312   : > { %1653 = vadd.xlane.f32.xlu0 %v1652_v51 }
 0x314   : > { %v2722_v52 = vpop.eup %2721 }
 0x315   : > { %v1655_v53 = vsel %vm543_vm1, %v2722_v52, 0.0 }
 0x316   : > { %1656 = vadd.xlane.f32.xlu1 %v1655_v53 }
 0x318   : > { %v2724_v54 = vpop.eup %2723 }
 0x319   : > { %v1658_v55 = vsel %vm543_vm1, %v2724_v54, 0.0 }
 0x31a   : > { %1659 = vadd.xlane.f32.xlu0 %v1658_v55 }
 0x31c   : > { %v2726_v56 = vpop.eup %2725 }
 0x31d   : > { %v1661_v57 = vsel %vm543_vm1, %v2726_v56, 0.0 }
 0x31e   : > { %1662 = vadd.xlane.f32.xlu1 %v1661_v57 }
 0x39b   : > { %v1654_v58 = vpop.xlane.xlu0 %1653 }
 0x39c   : > { %2727 = vrcp.f32 %v1654_v58 }
 0x39f   : > { %v1657_v59 = vpop.xlane.xlu1 %1656 }
 0x3a0   : > { %2729 = vrcp.f32 %v1657_v59 }
 0x3a3   : > { %v1660_v60 = vpop.xlane.xlu0 %1659 }
 0x3a4   : > { %2731 = vrcp.f32 %v1660_v60 }
 0x3a7   : > { %v1663_v61 = vpop.xlane.xlu1 %1662 }
 0x3a8   : > { %2733 = vrcp.f32 %v1663_v61 }
 0x3a9   : > { %v2728_v62 = vpop.eup %2727 }
 0x3aa   : > { %v1668_v63 = vmul.f32 %v2728_v62, %v2720_v50 }
 0x3ac   : > { %v1672_v1 = vpack.c.bf16 %v1668_v63, %v1668_v63 }
 0x3ad   : > { %v2730_v2 = vpop.eup %2729 }
 0x3ae   : > { %2570 = vmatmul.mubr.msk.bf16.vlgmr.msra.gmra.mxu0 %vm543_vm1, %v1672_v1  ;;  %v1669_v3 = vmul.f32 %v2730_v2, %v2722_v52 }
 0x3af   : > { %2580 = vmatpush3.bf16.msra.mxu0 %v3484_v35  ;;  %2581 = vmatprep.mubr.msk.bf16.mxu0 %vm3050_vm0, %v3049_v0 }
 0x3b0   : > { %v1673_v4 = vpack.c.bf16 %v1669_v3, %v1669_v3  ;;  %2591 = vmatprep.subr.mxu0 %v3049_v0 }
 0x3b1   : > { %v2732_v5 = vpop.eup %2731 }
 0x3b2   : > { %2576 = vmatmul.mubr.msk.bf16.vlgmr.msra.gmra.mxu1 %vm543_vm1, %v1673_v4  ;;  %v1670_v6 = vmul.f32 %v2732_v5, %v2724_v54 }
 0x3b3   : > { %2586 = vmatpush3.bf16.msra.mxu1 %v3487_v36  ;;  %2587 = vmatprep.mubr.msk.bf16.mxu1 %vm3050_vm0, %v3049_v0  ;;  %v1867_v36 = vld [vmem:[#allocation14 + $0x8] sm:$0xff] }
 0x3b4   : > { %v1674_v7 = vpack.c.bf16 %v1670_v6, %v1670_v6  ;;  %2596 = vmatprep.subr.mxu1 %v3049_v0 }
 0x3b5   : > { %v2734_v8 = vpop.eup %2733 }
 0x3b6   : > { %2582 = vmatmul.mubr.msk.bf16.vlgmr.msra.gmra.mxu0 %vm543_vm1, %v1674_v7  ;;  %v1671_v35 = vmul.f32 %v2734_v8, %v2726_v56 }
 0x3b7   : > { %2593 = vmatprep.mubr.msk.f32.mxu0 %vm3050_vm0, %v3049_v0  ;;  %2592 = vmatpush3.msra.mxu0 %v1867_v36 }
 0x3b8   : > { %v1675_v9 = vpack.c.bf16 %v1671_v35, %v1671_v35  ;;  %2601 = vmatprep.subr.mxu0 %v3049_v0 }
 0x3ba   : > { %2588 = vmatmul.mubr.msk.bf16.vlgmr.msra.gmra.mxu1 %vm543_vm1, %v1675_v9 }
 0x3bb   : > { %2598 = vmatprep.mubr.msk.f32.mxu1 %vm3050_vm0, %v3049_v0  ;;  %2597 = vmatpush3.msra.mxu1 %v1865_v10 }
 0x3bc   : > { %2606 = vmatprep.subr.mxu1 %v3049_v0 }
 0x46e   : > { %v1721_v12 = vpop.f32.mrf.mxu0 }
 0x46f   : > { %2599 = vmatmul.mubr.msk.f32.vlgmr.msra.gmra.mxu1 %vm543_vm1, %v1721_v12 }
 0x470   : > { %v2571_v13 = vpop.f32.mrf.mxu0  ;;  %2607 = vmatpush3.msra.mxu1 %v2091_v11  ;;  %2608 = vmatprep.mubr.msk.f32.mxu1 %vm3050_vm0, %v3049_v0 }
 0x472   : > { %v1724_v15 = vpop.f32.mrf.mxu0  ;;  %v1767_v16 = vpop.f32.mrf.mxu1 }
 0x473   : > { %2594 = vmatmul.mubr.msk.f32.vlgmr.msra.gmra.mxu0 %vm543_vm1, %v1767_v16 }
 0x474   : > { %v2572_v17 = vpop.f32.mrf.mxu0  ;;  %v2577_v18 = vpop.f32.mrf.mxu1  ;;  %2602 = vmatpush3.msra.mxu0 %v2015_v14  ;;  %2603 = vmatprep.mubr.msk.f32.mxu0 %vm3050_vm0, %v3049_v0 }
 0x476   : > { %v1770_v19 = vpop.f32.mrf.mxu1  ;;  %v1813_v20 = vpop.f32.mrf.mxu0 }
 0x477   : > { %2604 = vmatmul.mubr.msk.f32.vlgmr.msra.gmra.mxu0 %vm543_vm1, %v1813_v20 }
 0x478   : > { %v2578_v21 = vpop.f32.mrf.mxu1  ;;  %v2583_v22 = vpop.f32.mrf.mxu0 }
 0x47a   : > { %v1816_v23 = vpop.f32.mrf.mxu0  ;;  %v1859_v24 = vpop.f32.mrf.mxu1 }
 0x47b   : > { %2609 = vmatmul.mubr.msk.f32.vlgmr.msra.gmra.mxu1 %vm543_vm1, %v1859_v24 }
 0x47c   : > { %v2584_v25 = vpop.f32.mrf.mxu0  ;;  %v2589_v26 = vpop.f32.mrf.mxu1 }
 0x47e   : > { %v1862_v27 = vpop.f32.mrf.mxu1 }
 0x480   : > { %v2590_v28 = vpop.f32.mrf.mxu1 }
 0x52f   : > { %v2010_v29 = vpop.f32.mrf.mxu1 }
 0x531   : > { %v2600_v30 = vpop.f32.mrf.mxu1 }
 0x533   : > { %v1937_v31 = vpop.f32.mrf.mxu0 }
 0x534   : > { %v2011_v33 = vadd.f32 %v2010_v29, %v1937_v31 }
 0x535   : > { %v2595_v0 = vpop.f32.mrf.mxu0 }
 0x537   : > { %v2085_v32 = vpop.f32.mrf.mxu0 }
 0x538   : > { %v2089_v37 = vadd.f32 %v2085_v32, %v2011_v33 }
 0x539   : > { %v2605_v34 = vpop.f32.mrf.mxu0 }
 0x53b   : > { %v2161_v38 = vpop.f32.mrf.mxu1 }
 0x53c   : > { %v2165_v40 = vadd.f32 %v2161_v38, %v2089_v37 }
 0x53d   : > { %v2610_v41 = vpop.f32.mrf.mxu1 }
 0x53e   : > { %v2173_v42 = vadd.f32 %v2417_v39, %v2165_v40 }
 0x540   : > { %2175 = vst.msk [vmem:[%s525_s19] sm:$0xff] %vm2174_vm3, %v2173_v42 }
 0x541   : > { %2964 = shalt.err (!%p2961_p0)
}
 0x542   : > { %s2965_s1 = scalar_lea.hbm %s2188_s5, 128  ;;  %s2969_s0 = scalar_lea.hbm %s3655_s14, 256 }
 0x543   : > { %p2966_p9 = scmp.ne.s32.totalorder %s2188_s5, %s2965_s1  ;;  %p2970_p8 = scmp.lt.s32.totalorder %s2188_s5, %s3655_s14 }
 0x544   : > { %p2971_p11 = scmp.lt.s32.totalorder %s2969_s0, %s2965_s1 }
 0x545   : > { %p2967_p1 = pnand %p2966_p9, %p3656_p5 }
 0x546   : > { %p2972_p12 = por %p2971_p11, %p2970_p8 }
 0x547   : > { %p2968_p6 = pneg %p2967_p1 }
 0x549   : > { %p2973_p10 = pnand %p2972_p12, %p2968_p6 }
 0x54b   : > { %2976 = shalt.err (!%p2973_p10)
}
 0x54c   : > { %2635 = dma.vmem_to_hbm [thread:$0]  (%p3656_p5), %s2191_s4, 128, %s2188_s5, %s2177_s28  }
 0x54d PF: > { %s3657_s16 = sld [smem:[#allocation24_spill]]  ;;  %p3660_p3 = scmp.ge.s32.totalorder %s3035_s12, 2 }
 0x54e   : > { %s3658_s18 = sld [smem:[#allocation26_spill]] }
 0x553   : > { %s2202_s9 = sand.u32 1, %s3657_s16  }
 0x554   : > { %p3659_p4 = scmp.ne.s32.totalorder %s3658_s18, 0  ;;  %s2203_s25 = scalar_lea.sflag [#allocation4], %s2202_s9 }
 0x556   : > { %p2664_p7 = pnand %p3660_p3, %p3659_p4 }
 0x558   : > { %p2665_p2 = pneg %p2664_p7 }
 0x55a   : > { %3018 = dma.done.wait (%p2665_p2), %s2203_s25, 128  }
 0x55b   : > { %3020 = vsyncadd (%p2665_p2), %s2203_s25, 4294967168  ;;  %s3661_s12 = sld [smem:[#allocation27_spill]]  ;;  %s3664_s30 = smov %s3027_s10 }
 0x55c   : > { %s3662_s15 = sld [smem:[#allocation25_spill]] }
 0x55d   : > { %s3663_s11 = sld [smem:[#allocation28_spill]] }
 0x561   : > { %p30_p13 = scmp.ge.s32.totalorder %s3661_s12, 4  }
 0x562   : > { %s3665_s10 = smov %s3662_s15 }
 0x563   :  { %32 = sbr.rel (!%p30_p13) target bundleno = 19 (0x13), region = 157 }
 0x568   :  { %2208 = vsyncpa [#allocation3], 1 }
 0x569   :  { %2210 = vsyncpa [#allocation3 + $0x1], 1 }
 0x56a   :  { %2211 = vsyncpa [#allocation6], 1 }
 0x56b   :  { %2213 = vsyncpa [#allocation6 + $0x1], 1 }
 0x56c   :  { %2214 = vsyncpa [#allocation9], 1 }
 0x56d   :  { %2216 = vsyncpa [#allocation9 + $0x1], 1 }
 0x56e   :  { %2217 = vsyncpa [#allocation12], 1 }
 0x56f   :  { %2218 = vsyncpa [#allocation15], 1 }
 0x570   :  { %2219 = vsyncpa [#allocation4], 1 }
 0x571   :  { %2221 = vsyncpa [#allocation4 + $0x1], 1 }

</bundles_post_ra>
